<compile_context>
chip_gen: v7x
topology: tpu7x:2x2x1
jax: 0.10.0
libtpu: 0.0.40
codegen_flags: <defaults>
</compile_context>

<pallas_src>
import jax
import jax.numpy as jnp
from jax.experimental import pallas as pl
from jax.experimental.pallas import tpu as pltpu


def mobilevitv2_attn_kernel(x_ref, wi_ref, bi_ref, wkv_ref, bkv_ref,
                            wo_ref, bo_ref, o_ref):
    bt, n, d = x_ref.shape
    x = x_ref[...]                                   # (Bt, N, D) bf16
    x2 = x.reshape(bt * n, d)                        # merge leading dims (layout-free)

    # ---- fc_i on the VPU: elementwise mul (f32) + lane reduction (no 1-col matmul).
    # bi is a uniform pre-softmax shift (softmax-invariant), kept for fidelity; SMEM scalar.
    i = jnp.sum(x2.astype(jnp.float32) * wi_ref[...], axis=-1, keepdims=True) + bi_ref[0]
    i = i.reshape(bt, n, 1)                                              # (Bt, N, 1) f32

    # ---- softmax over the sequence axis (per batch element), in f32.
    m = jnp.max(i, axis=1, keepdims=True)
    e = jnp.exp(i - m)
    denom = jnp.sum(e, axis=1, keepdims=True)
    weight_i = e * pl.reciprocal(denom, approx=True)                     # (Bt, N, 1)

    # ---- fused fc_k | fc_v projection: single (D, 2D) MXU matmul, bf16 in / f32 acc.
    kv = jnp.dot(x2, wkv_ref[...], preferred_element_type=jnp.float32) + bkv_ref[...]
    kv = kv.reshape(bt, n, 2 * d)
    k = kv[:, :, :d]            # lane split (tile-aligned when d_model % 128 == 0)
    v = kv[:, :, d:]

    # ---- context vector: softmax-weighted sum over the sequence (sublane reduce).
    context_vector = jnp.sum(weight_i * k, axis=1, keepdims=True)        # (Bt, 1, D)

    # ---- v = fc_v(x) * context_vector, then out = fc_o(v).
    v = v * context_vector
    v2 = v.reshape(bt * n, d).astype(jnp.bfloat16)                       # back onto bf16 MXU
    out = jnp.dot(v2, wo_ref[...], preferred_element_type=jnp.float32) + bo_ref[...]
    o_ref[...] = out.reshape(bt, n, d).astype(o_ref.dtype)


def _pick_block_b(B, N, D, budget_bytes=4 << 20):
    """Largest batch tile whose double-buffered x+out blocks fit the budget,
    while keeping >= 2 grid steps (pipeline fill / megacore) when B >= 2."""
    per_b = N * D * (2 + 4)                       # bf16 x block + f32 out block
    cap = max(1, budget_bytes // (2 * max(per_b, 1)))
    best = 1
    for bt in range(1, B + 1):
        if B % bt:
            continue
        if bt > cap:
            break
        if B >= 2 and (B // bt) < 2:
            continue
        best = bt
    return best


def _const_spec(shape):
    # Constant index_map: the pipeline fetches this block once and reuses it.
    nd = len(shape)
    return pl.BlockSpec(shape, lambda b, _nd=nd: (0,) * _nd)


def mobilevitv2_attention(x, params, *, block_b=None):
    """x: (B, N, D) float32. params: dict of linear weights/biases (torch layout W:(out,in))."""
    B, N, D = x.shape
    out_dtype = x.dtype

    # Pre-transpose the square weights ONCE to (in, out) and fuse K|V into one RHS.
    # MXU operands are bf16; accumulation stays f32 inside the kernel.
    x_bf = x.astype(jnp.bfloat16)
    wkv_t = jnp.concatenate([params["wk"].T, params["wv"].T], axis=-1).astype(jnp.bfloat16)  # (D, 2D)
    bkv = jnp.concatenate(
        [params["bk"].reshape(1, D), params["bv"].reshape(1, D)], axis=-1
    ).astype(jnp.float32)                                                                    # (1, 2D)
    wo_t = params["wo"].T.astype(jnp.bfloat16)                                               # (D, D)
    wi = params["wi"].astype(jnp.float32)                   # (1, D), used on the VPU
    bi = params["bi"].reshape(1).astype(jnp.float32)        # scalar -> SMEM
    bo = params["bo"].reshape(1, D).astype(jnp.float32)

    bt = block_b if block_b is not None else _pick_block_b(B, N, D)
    assert B % bt == 0, "batch tile must divide B"
    grid = (B // bt,)

    # VMEM budget: double-buffered x/out blocks + weights (x2 buffers) + temp headroom.
    blk_bytes = bt * N * D * (2 + 4)
    w_bytes = 3 * D * D * 2 + D * 4 + 4 * D * 4
    est = 2 * blk_bytes + 2 * w_bytes + 6 * bt * N * D * 4
    cp_kwargs = dict(dimension_semantics=("parallel",))
    if est > (16 << 20):
        cp_kwargs["vmem_limit_bytes"] = min(int(est * 1.25), 64 << 20)  # v7x physical cap

    return pl.pallas_call(
        mobilevitv2_attn_kernel,
        out_shape=jax.ShapeDtypeStruct((B, N, D), out_dtype),
        grid_spec=pltpu.PrefetchScalarGridSpec(
            num_scalar_prefetch=0,
            grid=grid,
            in_specs=[
                pl.BlockSpec((bt, N, D), lambda b: (b, 0, 0)),      # x (bf16)
                _const_spec(wi.shape),                              # fc_i weight row
                pl.BlockSpec(memory_space=pltpu.MemorySpace.SMEM),  # fc_i bias scalar
                _const_spec(wkv_t.shape), _const_spec(bkv.shape),   # fused K|V proj
                _const_spec(wo_t.shape), _const_spec(bo.shape),     # output proj
            ],
            out_specs=pl.BlockSpec((bt, N, D), lambda b: (b, 0, 0)),
        ),
        compiler_params=pltpu.CompilerParams(**cp_kwargs),
    )(x_bf, wi, bi, wkv_t, bkv, wo_t, bo)


def make_params(key, d_model):
    """Deterministic init mirroring the module: Linear weights ~ N(0, 0.001), biases = 0."""
    k1, k2, k3, k4 = jax.random.split(key, 4)
    std = 0.001
    return {
        "wi": std * jax.random.normal(k1, (1, d_model), jnp.float32),
        "bi": jnp.zeros((1, 1), jnp.float32),
        "wk": std * jax.random.normal(k2, (d_model, d_model), jnp.float32),
        "bk": jnp.zeros((1, d_model), jnp.float32),
        "wv": std * jax.random.normal(k3, (d_model, d_model), jnp.float32),
        "bv": jnp.zeros((1, d_model), jnp.float32),
        "wo": std * jax.random.normal(k4, (d_model, d_model), jnp.float32),
        "bo": jnp.zeros((1, d_model), jnp.float32),
    }


def reference(x, p):
    """Plain-JAX f32 reference of the PyTorch forward, for validation."""
    i = x @ p["wi"].T + p["bi"]                            # (B, N, 1)
    w = jax.nn.softmax(i, axis=1)
    k = x @ p["wk"].T + p["bk"]
    ctx = jnp.sum(w * k, axis=1, keepdims=True)            # (B, 1, D)
    v = (x @ p["wv"].T + p["bv"]) * ctx
    return v @ p["wo"].T + p["bo"]


if __name__ == "__main__":
    B, N, D = 2, 8, 32
    key = jax.random.PRNGKey(0)
    kx, kp = jax.random.split(key)
    x = jax.random.normal(kx, (B, N, D), jnp.float32)
    params = make_params(kp, D)

    out = jax.block_until_ready(mobilevitv2_attention(x, params))
    ref = reference(x, params)

    assert out.shape == (B, N, D)
    # bf16 MXU path: compare with a scale-relative tolerance instead of 1e-5 allclose.
    scale = jnp.max(jnp.abs(ref)) + 1e-12
    rel_err = jnp.max(jnp.abs(out.astype(jnp.float32) - ref)) / scale
    assert rel_err < 5e-2, f"mismatch vs reference (rel_err={rel_err})"
    print("KERNEL_OK")
</pallas_src>

<mosaic_0001>
module attributes {stable_mosaic.version = 11 : i64} {
  func.func @mobilevitv2_attn_kernel(%arg0: i32, %arg1: memref<1x8x32xbf16, #tpu.memory_space<vmem>>, %arg2: memref<1x32xf32, #tpu.memory_space<vmem>>, %arg3: memref<1xf32, #tpu.memory_space<smem>>, %arg4: memref<32x64xbf16, #tpu.memory_space<vmem>>, %arg5: memref<1x64xf32, #tpu.memory_space<vmem>>, %arg6: memref<32x32xbf16, #tpu.memory_space<vmem>>, %arg7: memref<1x32xf32, #tpu.memory_space<vmem>>, %arg8: memref<1x8x32xf32, #tpu.memory_space<vmem>>) attributes {dimension_semantics = [#tpu.dimension_semantics<parallel>], iteration_bounds = array<i64: 2>, scalar_prefetch = 0 : i64, scratch_operands = 0 : i64, tpu.core_type = #tpu.core_type<tc>, window_params = [{transform_indices = @transform_0, window_bounds = array<i64: 1, 8, 32>}, {pipeline_mode = #tpu.pipeline_mode<synchronous>, transform_indices = @transform_1, window_bounds = array<i64: 1, 32>}, {transform_indices = @transform_2, window_bounds = array<i64: 1>}, {pipeline_mode = #tpu.pipeline_mode<synchronous>, transform_indices = @transform_3, window_bounds = array<i64: 32, 64>}, {pipeline_mode = #tpu.pipeline_mode<synchronous>, transform_indices = @transform_4, window_bounds = array<i64: 1, 64>}, {pipeline_mode = #tpu.pipeline_mode<synchronous>, transform_indices = @transform_5, window_bounds = array<i64: 32, 32>}, {pipeline_mode = #tpu.pipeline_mode<synchronous>, transform_indices = @transform_6, window_bounds = array<i64: 1, 32>}, {transform_indices = @transform_7, window_bounds = array<i64: 1, 8, 32>}]} {
    %c0 = arith.constant 0 : index
    %c0_0 = arith.constant 0 : index
    %c0_1 = arith.constant 0 : index
    %0 = vector.load %arg1[%c0, %c0_0, %c0_1] : memref<1x8x32xbf16, #tpu.memory_space<vmem>>, vector<1x8x32xbf16>
    %1 = vector.shape_cast %0 : vector<1x8x32xbf16> to vector<8x32xbf16>
    %2 = arith.extf %1 : vector<8x32xbf16> to vector<8x32xf32>
    %c0_2 = arith.constant 0 : index
    %c0_3 = arith.constant 0 : index
    %3 = vector.load %arg2[%c0_2, %c0_3] : memref<1x32xf32, #tpu.memory_space<vmem>>, vector<1x32xf32>
    %4 = vector.broadcast %3 : vector<1x32xf32> to vector<8x32xf32>
    %5 = arith.mulf %2, %4 : vector<8x32xf32>
    %cst = arith.constant dense<0.000000e+00> : vector<8xf32>
    %6 = vector.multi_reduction <add>, %5, %cst [1] : vector<8x32xf32> to vector<8xf32>
    %7 = vector.shape_cast %6 : vector<8xf32> to vector<8x1xf32>
    %c0_4 = arith.constant 0 : index
    %8 = memref.load %arg3[%c0_4] : memref<1xf32, #tpu.memory_space<smem>>
    %9 = vector.broadcast %8 : f32 to vector<8x1xf32>
    %10 = arith.addf %7, %9 : vector<8x1xf32>
    %11 = vector.shape_cast %10 : vector<8x1xf32> to vector<1x8x1xf32>
    %cst_5 = arith.constant dense<0xFF800000> : vector<1x1xf32>
    %12 = vector.multi_reduction <maximumf>, %11, %cst_5 [1] : vector<1x8x1xf32> to vector<1x1xf32>
    %13 = vector.shape_cast %12 : vector<1x1xf32> to vector<1x1x1xf32>
    %14 = vector.broadcast %13 : vector<1x1x1xf32> to vector<1x8x1xf32>
    %15 = arith.subf %11, %14 : vector<1x8x1xf32>
    %16 = math.exp %15 : vector<1x8x1xf32>
    %cst_6 = arith.constant dense<0.000000e+00> : vector<1x1xf32>
    %17 = vector.multi_reduction <add>, %16, %cst_6 [1] : vector<1x8x1xf32> to vector<1x1xf32>
    %18 = vector.shape_cast %17 : vector<1x1xf32> to vector<1x1x1xf32>
    %19 = tpu.reciprocal %18 {approx = true} : vector<1x1x1xf32> -> vector<1x1x1xf32>
    %20 = vector.broadcast %19 : vector<1x1x1xf32> to vector<1x8x1xf32>
    %21 = arith.mulf %16, %20 : vector<1x8x1xf32>
    %c0_7 = arith.constant 0 : index
    %c0_8 = arith.constant 0 : index
    %22 = vector.load %arg4[%c0_7, %c0_8] : memref<32x64xbf16, #tpu.memory_space<vmem>>, vector<32x64xbf16>
    %cst_9 = arith.constant dense<0.000000e+00> : vector<8x64xf32>
    %23 = tpu.matmul %1, %22, %cst_9 {dimension_numbers = #tpu.dot_dimension_numbers<[1], [0], [0], [1], [0, 0, 1, 1], [], []>} : vector<8x32xbf16>, vector<32x64xbf16>, vector<8x64xf32> -> vector<8x64xf32>
    %c0_10 = arith.constant 0 : index
    %c0_11 = arith.constant 0 : index
    %24 = vector.load %arg5[%c0_10, %c0_11] : memref<1x64xf32, #tpu.memory_space<vmem>>, vector<1x64xf32>
    %25 = vector.broadcast %24 : vector<1x64xf32> to vector<8x64xf32>
    %26 = arith.addf %23, %25 : vector<8x64xf32>
    %27 = vector.shape_cast %26 : vector<8x64xf32> to vector<1x8x64xf32>
    %28 = vector.extract_strided_slice %27 {offsets = [0, 0, 0], sizes = [1, 8, 32], strides = [1, 1, 1]} : vector<1x8x64xf32> to vector<1x8x32xf32>
    %29 = vector.extract_strided_slice %27 {offsets = [0, 0, 32], sizes = [1, 8, 32], strides = [1, 1, 1]} : vector<1x8x64xf32> to vector<1x8x32xf32>
    %30 = vector.broadcast %21 : vector<1x8x1xf32> to vector<1x8x32xf32>
    %31 = arith.mulf %30, %28 : vector<1x8x32xf32>
    %cst_12 = arith.constant dense<0.000000e+00> : vector<1x32xf32>
    %32 = vector.multi_reduction <add>, %31, %cst_12 [1] : vector<1x8x32xf32> to vector<1x32xf32>
    %33 = vector.shape_cast %32 : vector<1x32xf32> to vector<1x1x32xf32>
    %34 = vector.broadcast %33 : vector<1x1x32xf32> to vector<1x8x32xf32>
    %35 = arith.mulf %29, %34 : vector<1x8x32xf32>
    %36 = vector.shape_cast %35 : vector<1x8x32xf32> to vector<8x32xf32>
    %37 = arith.truncf %36 : vector<8x32xf32> to vector<8x32xbf16>
    %c0_13 = arith.constant 0 : index
    %c0_14 = arith.constant 0 : index
    %38 = vector.load %arg6[%c0_13, %c0_14] : memref<32x32xbf16, #tpu.memory_space<vmem>>, vector<32x32xbf16>
    %cst_15 = arith.constant dense<0.000000e+00> : vector<8x32xf32>
    %39 = tpu.matmul %37, %38, %cst_15 {dimension_numbers = #tpu.dot_dimension_numbers<[1], [0], [0], [1], [0, 0, 1, 1], [], []>} : vector<8x32xbf16>, vector<32x32xbf16>, vector<8x32xf32> -> vector<8x32xf32>
    %c0_16 = arith.constant 0 : index
    %c0_17 = arith.constant 0 : index
    %40 = vector.load %arg7[%c0_16, %c0_17] : memref<1x32xf32, #tpu.memory_space<vmem>>, vector<1x32xf32>
    %41 = vector.broadcast %40 : vector<1x32xf32> to vector<8x32xf32>
    %42 = arith.addf %39, %41 : vector<8x32xf32>
    %43 = vector.shape_cast %42 : vector<8x32xf32> to vector<1x8x32xf32>
    %c0_18 = arith.constant 0 : index
    %c0_19 = arith.constant 0 : index
    %c0_20 = arith.constant 0 : index
    %44 = vector.load %arg8[%c0_18, %c0_19, %c0_20] : memref<1x8x32xf32, #tpu.memory_space<vmem>>, vector<1x8x32xf32>
    tpu.vector_store %arg8[%c0_18, %c0_19, %c0_20], %43 {strides = array<i32>} : memref<1x8x32xf32, #tpu.memory_space<vmem>>, vector<1x8x32xf32>,
    return
  }
  func.func @transform_0(%arg0: i32) -> (i32, i32, i32) {
    %c0_i32 = arith.constant 0 : i32
    %c0_i32_0 = arith.constant 0 : i32
    %c0_i32_1 = arith.constant 0 : i32
    return %arg0, %c0_i32, %c0_i32_0 : i32, i32, i32
  }
  func.func @transform_1(%arg0: i32) -> (i32, i32) {
    %c0_i32 = arith.constant 0 : i32
    %c0_i32_0 = arith.constant 0 : i32
    %c0_i32_1 = arith.constant 0 : i32
    return %c0_i32, %c0_i32_0 : i32, i32
  }
  func.func @transform_2(%arg0: i32) -> i32 {
    %c0_i32 = arith.constant 0 : i32
    %c0_i32_0 = arith.constant 0 : i32
    return %c0_i32 : i32
  }
  func.func @transform_3(%arg0: i32) -> (i32, i32) {
    %c0_i32 = arith.constant 0 : i32
    %c0_i32_0 = arith.constant 0 : i32
    %c0_i32_1 = arith.constant 0 : i32
    return %c0_i32, %c0_i32_0 : i32, i32
  }
  func.func @transform_4(%arg0: i32) -> (i32, i32) {
    %c0_i32 = arith.constant 0 : i32
    %c0_i32_0 = arith.constant 0 : i32
    %c0_i32_1 = arith.constant 0 : i32
    return %c0_i32, %c0_i32_0 : i32, i32
  }
  func.func @transform_5(%arg0: i32) -> (i32, i32) {
    %c0_i32 = arith.constant 0 : i32
    %c0_i32_0 = arith.constant 0 : i32
    %c0_i32_1 = arith.constant 0 : i32
    return %c0_i32, %c0_i32_0 : i32, i32
  }
  func.func @transform_6(%arg0: i32) -> (i32, i32) {
    %c0_i32 = arith.constant 0 : i32
    %c0_i32_0 = arith.constant 0 : i32
    %c0_i32_1 = arith.constant 0 : i32
    return %c0_i32, %c0_i32_0 : i32, i32
  }
  func.func @transform_7(%arg0: i32) -> (i32, i32, i32) {
    %c0_i32 = arith.constant 0 : i32
    %c0_i32_0 = arith.constant 0 : i32
    %c0_i32_1 = arith.constant 0 : i32
    return %arg0, %c0_i32, %c0_i32_0 : i32, i32, i32
  }
}

</mosaic_0001>

<bundles_post_ra>
// kernel: tpu_custom_call.1
= control target key start
LH: loop header
LB: loop body
LE: loop exit
PB: predicated region body
PF: predicated region fallthrough
CT: control target
= control target key end

     0   :  { %s1104_s0 = inlined_call_operand.hbm [shape: bf16[2,8,32], index: 0, kind: input, shape index: {}]   ;;  %s1105_s1 = inlined_call_operand.vmem [shape: f32[1,32], index: 1, kind: input, shape index: {}]   ;;  %s1106_s2 = inlined_call_operand.<no memory space> [shape: f32[1], index: 2, kind: input, shape index: {}]   ;;  %s1107_s3 = inlined_call_operand.hbm [shape: bf16[32,64], index: 3, kind: input, shape index: {}]   ;;  %s1108_s4 = inlined_call_operand.vmem [shape: f32[1,64], index: 4, kind: input, shape index: {}]   ;;  %s1109_s5 = inlined_call_operand.vmem [shape: bf16[32,32], index: 5, kind: input, shape index: {}]   ;;  %s1110_s6 = inlined_call_operand.vmem [shape: f32[1,32], index: 6, kind: input, shape index: {}]   ;;  %s1111_s7 = inlined_call_operand.hbm [shape: f32[2,8,32], index: 7, kind: output, shape index: {}]  }
   0x1   :  { %12 = sst [smem:[#allocation2]] %s1106_s2 }
   0x2   :  { %13 = vsyncpa [#allocation4], 0 }
   0x3   :  { %15 = vsyncpa [#allocation4 + $0x1], 0 }
   0x4   :  { %16 = vsyncpa [#allocation7], 0 }
   0x5   :  { %17 = vsyncpa [#allocation5], 0 }
   0x6   :  { %19 = vsyncpa [#allocation5 + $0x1], 0  ;;  %s887_s26 = smov 0   ;;  %s889_s27 = smov 0  }
   0x7   :  { %s891_s28 = smov 0   ;;  %s893_s29 = smov 0  }
   0x8 LB: > { %s908_s2 = sadd.s32 4294967295, %s833_s29   ;;  %s589_s30 = sadd.s32 4294967294, %s833_s29   ;;  %s833_s29 = sphi %s893_s29, %s1131_s29   ;;  %s829_s28 = sphi %s891_s28, %s1130_s28   ;;  %s825_s27 = sphi %s889_s27, %s1129_s27   ;;  %s821_s26 = sphi %s887_s26, %s1128_s26  }
   0x9   : > { %p45_p0 = scmp.ne.s32.totalorder %s825_s27, %s821_s26  ;;  %p1112_p1 = scmp.eq.s32.totalorder %s908_s2, 0 }
   0xa   : > { %p201_p3 = scmp.eq.s32.totalorder %s589_s30, 1  ;;  %p590_p5 = scmp.ge.s32.totalorder %s833_s29, 1 }
   0xb   : > { %p917_p4 = por %p1112_p1, %p45_p0  ;;  %p208_p7 = scmp.lt.s32.totalorder %s833_s29, 3 }
   0xc   : > { %p922_p6 = por %p201_p3, %p45_p0  ;;  %s835_s11 = smov [#allocation6]  }
   0xd   : > { %s1115_s8 = scalar_select %p917_p4, 1, 0 }
   0xe   : > { %s1116_s9 = scalar_select %p922_p6, 1, 0 }
   0xf   : > { %p927_p8 = pnand %p590_p5, %p208_p7  ;;  %s226_s12 = sshll.u32 %s835_s11, 4  ;;  %s931_s12 = int_to_ptr.vmem [resolvable:$true] %s226_s12 }
  0x10   : > { %s943_s14 = sadd.s32 1, %s833_s29   ;;  %s32_s15 = sadd.s32 1, %s829_s28 }
  0x11   : > { %s1117_s10 = scalar_select %p927_p8, 1, 0 }
  0x12   : > { %p642_p9 = pneg %p927_p8  ;;  %s29_s16 = ssub.s32 %s833_s29, %s943_s14 }
  0x13   : > { %s705_s19 = scalar_lea.hbm %s1107_s3, 256 }
  0x14   : > { %p938_p11 = pnand %p642_p9, %p1112_p1  ;;  %p706_p12 = scmp.ne.s32.totalorder %s1107_s3, %s705_s19 }
  0x15   : > { %p712_p5 = scmp.lt.u32.totalorder %s705_s19, %s1107_s3 }
  0x16   : > { %p707_p13 = pneg %p938_p11 }
  0x18   : > { %p708_p0 = pnand %p707_p13, %p706_p12 }
  0x1a   : > { %p709_p3 = pneg %p708_p0 }
  0x1c   : > { %p714_p7 = pnand %p712_p5, %p709_p3 }
  0x1e   : > { %717 = shalt.err (!%p714_p7)
}
  0x1f   : > { %s718_s24 = scalar_lea.vmem %s931_s12, 256  ;;  %p726_p2 = scmp.lt.s32.totalorder %s931_s12, %s931_s12 }
  0x20   : > { %p719_p9 = scmp.ne.s32.totalorder %s931_s12, %s718_s24  ;;  %p727_p6 = scmp.lt.s32.totalorder %s718_s24, %s718_s24 }
  0x22   : > { %p721_p10 = pnand %p719_p9, %p707_p13  ;;  %p728_p4 = por %p727_p6, %p726_p2 }
  0x24   : > { %p722_p1 = pneg %p721_p10 }
  0x26   : > { %p729_p8 = pnand %p728_p4, %p722_p1 }
  0x28   : > { %732 = shalt.err (!%p729_p8)
}
  0x29   : > { %s836_s25 = smov 64   ;;  %s837_s30 = smov 4  }
  0x2a   : > { %645 = dma.hbm_to_vmem [thread:$0]  (!%p938_p11), %s1107_s3, 256, %s931_s12, [#allocation7], %s836_s25, %s836_s25, %s837_s30  }
  0x2b   : > { %p30_p2 = scmp.eq.s32.totalorder %s29_s16, 0  ;;  %p39_p1 = scmp.ne.s32.totalorder %s829_s28, %s825_s27 }
  0x2c   : > { %p40_p4 = scmp.eq.s32.totalorder %s833_s29, 0  ;;  %p655_p6 = scmp.lt.s32.totalorder %s833_s29, 2 }
  0x2d   : > { %s974_s18 = scalar_select %p30_p2, %s829_s28, %s32_s15  }
  0x2e   : > { %p41_p8 = por %p40_p4, %p39_p1  ;;  %p1119_p10 = scmp.eq.s32.totalorder %s908_s2, 1 }
  0x2f   : > { %s249_s20 = sand.u32 1, %s829_s28   ;;  %s594_s21 = sshll.u32 %s833_s29, 6 }
  0x30   : > { %p978_p12 = por %p1119_p10, %p39_p1  ;;  %s593_s22 = sshll.u32 %s249_s20, 2 }
  0x31   : > { %s987_s24 = scalar_lea.hbm %s1104_s0, %s594_s21  ;;  %s253_s12 = scalar_lea.vmem [#allocation3], %s593_s22 }
  0x32   : > { %s260_s15 = sshll.u32 %s253_s12, 4  ;;  %p989_p11 = pnand %p655_p6, %p41_p8  ;;  %s993_s15 = int_to_ptr.vmem [resolvable:$true] %s260_s15 }
  0x33   : > { %s250_s25 = scalar_lea.sflag [#allocation4], %s249_s20  ;;  %s733_s30 = scalar_lea.hbm %s987_s24, 64 }
  0x34   : > { %p734_p13 = scmp.ne.s32.totalorder %s987_s24, %s733_s30  ;;  %p735_p0 = pneg %p989_p11 }
  0x35   : > { %s738_s21 = scalar_lea.hbm %s1104_s0, 128  ;;  %p739_p7 = scmp.lt.u32.totalorder %s987_s24, %s1104_s0 }
  0x36   : > { %p736_p3 = pnand %p735_p0, %p734_p13  ;;  %p740_p9 = scmp.lt.u32.totalorder %s738_s21, %s733_s30 }
  0x37   : > { %p742_p1 = scmp.lt.u32.totalorder %s733_s30, %s987_s24 }
  0x38   : > { %p737_p5 = pneg %p736_p3  ;;  %p741_p2 = por %p740_p9, %p739_p7 }
  0x3a   : > { %p743_p4 = por %p742_p1, %p741_p2 }
  0x3c   : > { %p744_p6 = pnand %p743_p4, %p737_p5 }
  0x3e   : > { %747 = shalt.err (!%p744_p6)
}
  0x3f   : > { %s748_s20 = scalar_lea.vmem %s993_s15, 64  ;;  %s838_s23 = smov [#allocation3]  }
  0x40   : > { %p749_p8 = scmp.ne.s32.totalorder %s993_s15, %s748_s20  ;;  %s753_s12 = sshll.u32 %s838_s23, 4  ;;  %s754_s12 = int_to_ptr.vmem [resolvable:$false] %s753_s12 }
  0x41   : > { %s755_s11 = scalar_lea.vmem %s754_s12, 128  ;;  %p756_p3 = scmp.lt.s32.totalorder %s993_s15, %s754_s12 }
  0x42   : > { %p751_p10 = pnand %p749_p8, %p735_p0  ;;  %p757_p7 = scmp.lt.s32.totalorder %s755_s11, %s748_s20 }
  0x44   : > { %p752_p13 = pneg %p751_p10  ;;  %p758_p9 = por %p757_p7, %p756_p3 }
  0x46   : > { %p759_p2 = pnand %p758_p9, %p752_p13 }
  0x48   : > { %762 = shalt.err (!%p759_p2)
}
  0x49   : > { %649 = dma.hbm_to_vmem [thread:$0]  (!%p989_p11), %s987_s24, 64, %s993_s15, %s250_s25  }
  0x4a   : > { %p1122_p5 = scmp.ne.s32.totalorder %s1117_s10, 0 }
  0x4b   : > { %s1023_s30 = sand.u32 (!%p1122_p5), 1, %s825_s27   ;;  %p1123_p0 = scmp.ne.s32.totalorder (!%p1122_p5), %s1115_s8, 0 }
  0x4c   : > { %269 = sbr.rel (%p1122_p5) target bundleno = 788 (0x314), region = 48  ;;  %s596_s17 = sshll.u32 (!%p1122_p5), %s1023_s30, 2 }
  0x4d   : > { %s272_s21 = scalar_lea.sflag (!%p1122_p5), [#allocation4], %s1023_s30  ;;  %s275_s22 = scalar_lea.vmem (!%p1122_p5), [#allocation3], %s596_s17 }
  0x53   : > { %808 = dma.done.wait (%p1123_p0), %s272_s21, 64  }
  0x54   : > { %810 = vsyncadd (%p1123_p0), %s272_s21, 4294967232  ;;  %p1124_p1 = scmp.eq.s32.totalorder %s908_s2, 0 }
  0x56   : > { %812 = dma.done.wait (%p1124_p1), [#allocation7], 256   ;;  %p1125_p11 = pmov %p1124_p1 }
  0x57   : > { %v839_v0 = vmov 0.0   ;;  %vm840_vm0 = vmmov 0   ;;  %v697_v1 = vld [vmem:[#allocation6] sm:$0xff]   ;;  %v311_v2 = vld [vmem:[%s275_s22] sm:$0xf]  ;;  %vm321_vm1 = vcmask 261120  }
  0x58   : > { %814 = vsyncadd (%p1125_p11), [#allocation7], 4294967040  ;;  %618 = vmatprep.subr.bf16.mxu0 %v839_v0  ;;  %622 = vmatprep.mubr.msk.bf16.mxu0 %vm840_vm0, %v839_v0  ;;  %v599_v3 = vld [vmem:[%s1105_s1] ss:$0 sm:$0xff]  ;;  %v312_v4 = vunpack.c.l.bf16 %v311_v2  ;;  %v698_v5 = vld [vmem:[#allocation6 + $0x8] sm:$0xff]   ;;  %s325_s8 = sld [smem:[#allocation2]] }
  0x59   : > { %626 = vmatprep.subr.bf16.mxu1 %v839_v0  ;;  %630 = vmatprep.mubr.msk.bf16.mxu1 %vm840_vm0, %v839_v0  ;;  %v600_v27 = vld [vmem:[%s1108_s4] ss:$0 sm:$0xff]  ;;  %v700_v40 = vld [vmem:[%s1109_s5 + $0x8] sm:$0xff]   ;;  %s841_s12 = smov 32   ;;  %s842_s11 = smov 96  }
  0x5a   : > { %619 = vmatpush3.bf16.msra.mxu0 %v697_v1  ;;  %v320_v6 = vmul.f32 %v599_v3, %v312_v4  ;;  %v699_v38 = vld [vmem:[%s1109_s5] sm:$0xff]   ;;  %s598_s17 = sshll.u32 %s1023_s30, 3  ;;  %s609_s10 = sshll.u32 %s908_s2, 7 }
  0x5b   : > { %620 = vmatprep.subr.bf16.mxu0 %v839_v0  ;;  %627 = vmatpush3.bf16.msra.mxu1 %v699_v38  ;;  %v604_v48 = vld [vmem:[%s1110_s6] ss:$0 sm:$0xff]  ;;  %s309_s24 = scalar_lea.vmem [#allocation8], %s598_s17  ;;  %s1059_s25 = scalar_lea.hbm %s1111_s7, %s609_s10 }
  0x5c   : > { %v322_v7 = vsel %vm321_vm1, %v320_v6, 0.0  ;;  %628 = vmatprep.subr.bf16.mxu1 %v839_v0  ;;  %s496_s2 = scalar_lea.sflag [#allocation5], %s1023_s30  ;;  %s843_s20 = smov [#allocation8]  }
  0x5d   : > { %323 = vadd.xlane.f32.xlu0 %v322_v7  ;;  %s767_s23 = sshll.u32 %s843_s20, 4  ;;  %s768_s23 = int_to_ptr.vmem [resolvable:$false] %s767_s23 }
  0x5e   : > { %621 = vmatpush3.bf16.msra.mxu0 %v698_v5  ;;  %v326_v8 = vstv %s325_s8  ;;  %s509_s8 = sshll.u32 %s309_s24, 4  ;;  %s1061_s8 = int_to_ptr.vmem [resolvable:$true] %s509_s8 }
  0x5f   : > { %629 = vmatpush3.bf16.msra.mxu1 %v700_v40  ;;  %s763_s13 = scalar_lea.vmem %s1061_s8, 128  ;;  %p770_p10 = scmp.lt.s32.totalorder %s1061_s8, %s768_s23 }
  0x60   : > { %p764_p4 = scmp.ne.s32.totalorder %s1061_s8, %s763_s13 }
  0x61   : > { %623 = vmatmul.mubr.msk.bf16.vlgmr.msra.gmra.mrb[0].mxu0 %vm321_vm1, %v311_v2 }
  0x62   : > { %p765_p6 = pnand %p764_p4, %p978_p12 }
  0x64   : > { %p766_p8 = pneg %p765_p6 }
  0xea   : > { %v324_v9 = vpop.xlane.xlu0 %323 }
  0xeb   : > { %v327_v10 = vadd.f32 %v326_v8, %v324_v9 }
  0xed   : > { %v328_v11 = vrot.slane %v327_v10, 4 }
  0xef   : > { %v329_v12 = vmax.f32 %v327_v10, %v328_v11 }
  0xf1   : > { %v330_v13 = vrot.slane %v329_v12, 2 }
  0xf3   : > { %v331_v14 = vmax.f32 %v329_v12, %v330_v13 }
  0xf5   : > { %v332_v15 = vrot.slane %v331_v14, 1 }
  0xf7   : > { %v333_v16 = vmax.f32 %v331_v14, %v332_v15 }
  0xf9   : > { %v334_v17 = vsub.f32 %v327_v10, %v333_v16 }
  0xfb   : > { %v335_v18 = vmul.f32 1.442695, %v334_v17 }
  0xfd   : > { %701 = vpow2.f32 %v335_v18 }
 0x107   : > { %v702_v19 = vpop.eup %701 }
 0x108   : > { %v337_v20 = vrot.slane %v702_v19, 4 }
 0x10a   : > { %v338_v21 = vadd.f32 %v702_v19, %v337_v20 }
 0x10c   : > { %v339_v22 = vrot.slane %v338_v21, 2 }
 0x10e   : > { %v340_v23 = vadd.f32 %v339_v22, %v338_v21 }
 0x110   : > { %v341_v24 = vrot.slane %v340_v23, 1 }
 0x112   : > { %v342_v25 = vadd.f32 %v341_v24, %v340_v23 }
 0x114   : > { %703 = vrcp.f32 %v342_v25 }
 0x11e   : > { %v704_v26 = vpop.eup %703 }
 0x11f   : > { %v344_v29 = vmul.f32 %v704_v26, %v702_v19 }
 0x134   : > { %v405_v28 = vpop.f32.mrb[0].mxu0 }
 0x135   : > { %v406_v30 = vadd.f32 %v600_v27, %v405_v28  ;;  %v624_v31 = vpop.f32.mrb[1].mxu0 }
 0x136   : > { %v408_v32 = vpop.f32.mrb[2].mxu0 }
 0x137   : > { %v411_v33 = vmul.f32 %v406_v30, %v344_v29  ;;  %v625_v34 = vpop.f32.mrb[3].mxu0 }
 0x139   : > { %v412_v35 = vsel %vm321_vm1, %v411_v33, 0.0 }
 0x13a   : > { %v413_v36 = vrot.slane %v412_v35, 4 }
 0x13c   : > { %v414_v37 = vadd.f32 %v413_v36, %v412_v35 }
 0x13e   : > { %v415_v39 = vrot.slane %v414_v37, 2 }
 0x140   : > { %v416_v41 = vadd.f32 %v415_v39, %v414_v37 }
 0x142   : > { %v417_v42 = vrot.slane %v416_v41, 1 }
 0x144   : > { %v418_v43 = vadd.f32 %v417_v42, %v416_v41 }
 0x146   : > { %420 = vrot.lane.b32.xlu0 %v418_v43, %s841_s12  ;;  %s769_s12 = scalar_lea.vmem %s768_s23, 256 }
 0x147   : > { %p771_p13 = scmp.lt.s32.totalorder %s769_s12, %s763_s13 }
 0x149   : > { %p772_p3 = por %p771_p13, %p770_p10 }
 0x14b   : > { %p773_p7 = pnand %p772_p3, %p766_p8 }
 0x1b8   : > { %v421_v44 = vpop.permute.xlu0 %420 }
 0x1b9   : > { %v423_v45 = vmul.f32 %v421_v44, %v406_v30 }
 0x1bb   : > { %v424_v46 = vpack.c.bf16 %v423_v45, %v423_v45 }
 0x1bd   : > { %437 = vrot.lane.b32.xlu1 %v424_v46, %s842_s11 }
 0x22f   : > { %v438_v47 = vpop.permute.xlu1 %437 }
 0x230   : > { %631 = vmatmul.mubr.msk.bf16.vlgmr.msra.gmra.mrb[0].mxu1 %vm321_vm1, %v438_v47 }
 0x303   : > { %v488_v49 = vpop.f32.mrb[0].mxu1 }
 0x304   : > { %v489_v50 = vadd.f32 %v604_v48, %v488_v49  ;;  %v632_v51 = vpop.f32.mrb[1].mxu1 }
 0x305   : > { %v491_v52 = vpop.f32.mrb[2].mxu1 }
 0x306   : > { %v633_v53 = vpop.f32.mrb[3].mxu1  ;;  %494 = vst.msk [vmem:[%s309_s24] sm:$0xff] %vm321_vm1, %v489_v50 }
 0x307   : > { %776 = shalt.err (!%p773_p7)
}
 0x308   : > { %s777_s30 = scalar_lea.hbm %s1059_s25, 128  ;;  %s781_s21 = scalar_lea.hbm %s1111_s7, 256 }
 0x309   : > { %p778_p9 = scmp.ne.s32.totalorder %s1059_s25, %s777_s30  ;;  %p782_p0 = scmp.lt.u32.totalorder %s1059_s25, %s1111_s7 }
 0x30a   : > { %p783_p1 = scmp.lt.u32.totalorder %s781_s21, %s777_s30  ;;  %p785_p4 = scmp.lt.u32.totalorder %s777_s30, %s1059_s25 }
 0x30b   : > { %p779_p2 = pnand %p778_p9, %p978_p12 }
 0x30c   : > { %p784_p11 = por %p783_p1, %p782_p0 }
 0x30d   : > { %p780_p5 = pneg %p779_p2 }
 0x30e   : > { %p786_p6 = por %p785_p4, %p784_p11 }
 0x310   : > { %p787_p8 = pnand %p786_p6, %p780_p5 }
 0x312   : > { %790 = shalt.err (!%p787_p8)
}
 0x313   : > { %640 = dma.vmem_to_hbm [thread:$0]  (%p978_p12), %s1061_s8, 128, %s1059_s25, %s496_s2  }
 0x314 PF: > { %s521_s24 = sand.u32 1, %s821_s26   ;;  %p1126_p10 = scmp.ne.s32.totalorder %s1116_s9, 0 }
 0x315   : > { %p1127_p13 = scmp.ge.s32.totalorder %s833_s29, 2  ;;  %s522_s15 = scalar_lea.sflag [#allocation5], %s521_s24 }
 0x317   : > { %p651_p3 = pnand %p1127_p13, %p1126_p10 }
 0x319   : > { %816 = dma.done.wait (!%p651_p3), %s522_s15, 128  }
 0x31a   : > { %818 = vsyncadd (!%p651_p3), %s522_s15, 4294967168  ;;  %p22_p7 = scmp.ge.s32.totalorder %s943_s14, 4   ;;  %s1128_s26 = smov %s825_s27 }
 0x31b   : > { %s1129_s27 = smov %s829_s28  ;;  %s1130_s28 = smov %s974_s18 }
 0x31c   : > { %s1131_s29 = smov %s943_s14  ;;  %24 = sbr.rel (!%p22_p7) target bundleno = 8 (0x8), region = 97 }
 0x323   :  { %527 = vsyncpa [#allocation4], 1 }
 0x324   :  { %529 = vsyncpa [#allocation4 + $0x1], 1 }
 0x325   :  { %530 = vsyncpa [#allocation7], 1 }
 0x326   :  { %531 = vsyncpa [#allocation5], 1 }
 0x327   :  { %533 = vsyncpa [#allocation5 + $0x1], 1 }

</bundles_post_ra>
